<compile_context>
chip_gen: v6e
topology: v6e:2x2x1
jax: 0.10.0
libtpu: 0.0.40
codegen_flags: <defaults>
</compile_context>

<pallas_src>
from functools import partial

import jax
import jax.numpy as jnp
from jax.experimental import pallas as pl
from jax.experimental.pallas import tpu as pltpu


PAD = 128        # lane width: all weight/bias columns padded to this
MAX_TB = 512     # batch-tile rows when batch is large (amortizes per-step cost)


def _round_up(x, m):
    return (x + m - 1) // m * m


def make_decoder_kernel(dims, offsets, bias_off):
    """Build the kernel closure with all static layout constants baked in."""
    latent_dim, h1, h0, input_dim = dims
    o1, o2, o3 = offsets

    def kernel(z_ref, p_ref, out_ref):
        f32 = jnp.float32

        # Static slices into the single packed parameter buffer (cheap views).
        w1 = p_ref[o1:o1 + latent_dim, :]          # (latent_dim, 128)
        w2 = p_ref[o2:o2 + h1, :]                  # (h1, 128)
        w3 = p_ref[o3:o3 + h0, :]                  # (h0, 128)
        b1 = p_ref[bias_off + 0:bias_off + 1, :]   # (1, 128)
        b2 = p_ref[bias_off + 1:bias_off + 2, :]
        b3 = p_ref[bias_off + 2:bias_off + 3, :]

        z = z_ref[...]                             # (TB, latent_dim), unpadded

        # fc1 + ReLU   (K = latent_dim)
        x = jnp.maximum(jnp.dot(z, w1, preferred_element_type=f32) + b1, 0.0)
        # fc2 + ReLU   (K = h1; padded lanes of x are exactly 0 and are dropped)
        x = jnp.maximum(
            jnp.dot(x[:, :h1], w2, preferred_element_type=f32) + b2, 0.0)
        # fc3 + sigmoid (K = h0)
        logits = jnp.dot(x[:, :h0], w3, preferred_element_type=f32) + b3

        out_ref[...] = jax.nn.sigmoid(logits[:, :input_dim])

    return kernel


def pack_params(layers):
    """Pack [(W, b)] (W:[in,out], b:[out]) into one compact (R,128) f32 slab.

    Returns (buffer, weight_row_offsets, bias_row_offset).  Each weight's row
    block starts on a sublane (multiple-of-8) boundary; biases occupy one row
    each after the last weight block.
    """
    offsets = []
    r = 0
    for w, _ in layers:
        assert w.shape[1] <= PAD, "fan_out must be <= 128 for this packing"
        offsets.append(r)
        r += _round_up(w.shape[0], 8)
    bias_off = r
    total_rows = _round_up(bias_off + len(layers), 8)

    buf = jnp.zeros((total_rows, PAD), jnp.float32)
    for i, (w, b) in enumerate(layers):
        fi, fo = w.shape
        buf = buf.at[offsets[i]:offsets[i] + fi, :fo].set(w)
        buf = buf.at[bias_off + i, :fo].set(b)
    return buf, tuple(offsets), bias_off


@partial(jax.jit, static_argnames=("dims", "offsets", "bias_off"))
def decoder_forward(z, packed_params, dims, offsets, bias_off):
    """z: (B, latent_dim) f32 -> (B, input_dim) f32."""
    latent_dim, h1, h0, input_dim = dims
    B = z.shape[0]

    # Batch tiling: single step for small B; 512-row tiles (parallel across
    # v7x's two TensorCores, pipelined z/out DMA on v5e/v6e) for large B.
    TB = B if B <= MAX_TB else MAX_TB
    Bp = _round_up(B, TB)
    zp = z if Bp == B else jnp.zeros((Bp, latent_dim), z.dtype).at[:B].set(z)

    kernel = make_decoder_kernel(dims, offsets, bias_off)

    out = pl.pallas_call(
        kernel,
        out_shape=jax.ShapeDtypeStruct((Bp, input_dim), jnp.float32),
        grid_spec=pltpu.PrefetchScalarGridSpec(
            num_scalar_prefetch=0,
            grid=(Bp // TB,),
            in_specs=[
                # batch tile of z (unpadded feature dim = full array extent)
                pl.BlockSpec((TB, latent_dim), lambda i: (i, 0)),
                # compact weight slab, resident across all grid steps
                pl.BlockSpec(packed_params.shape, lambda i: (0, 0)),
            ],
            out_specs=pl.BlockSpec((TB, input_dim), lambda i: (i, 0)),
        ),
        compiler_params=pltpu.CompilerParams(
            dimension_semantics=("parallel",)),
    )(zp, packed_params)

    return out if Bp == B else out[:B]
    # TODO(synk): optionally store weights in bf16 to halve the parameter DMA
    # (requires relaxing the f32 reference tolerance to ~1e-2).


def init_linear(key, fan_in, fan_out):
    """Deterministic init mimicking torch.nn.Linear (uniform +-1/sqrt(fan_in)).

    Returns W with shape [fan_in, fan_out] (transposed for x @ W) and bias
    with shape [fan_out].
    """
    kw, kb = jax.random.split(key)
    bound = 1.0 / jnp.sqrt(jnp.float32(fan_in))
    w = jax.random.uniform(kw, (fan_in, fan_out), jnp.float32, -bound, bound)
    b = jax.random.uniform(kb, (fan_out,), jnp.float32, -bound, bound)
    return w, b


def jax_reference(z, layers):
    (w1, b1), (w2, b2), (w3, b3) = layers
    h = jax.nn.relu(z @ w1 + b1)
    h = jax.nn.relu(h @ w2 + b2)
    return jax.nn.sigmoid(h @ w3 + b3)


if __name__ == "__main__":
    # Shapes consistent with the module: Decoder(input_dim, hidden_dims,
    # latent_dim) with fc1: latent->hidden[1], fc2: hidden[1]->hidden[0],
    # fc3: hidden[0]->input_dim.
    batch = 8
    input_dim = 64
    hidden_dims = [32, 16]
    latent_dim = 8

    key = jax.random.PRNGKey(0)
    keys = jax.random.split(key, 4)

    fc1 = init_linear(keys[0], latent_dim, hidden_dims[1])
    fc2 = init_linear(keys[1], hidden_dims[1], hidden_dims[0])
    fc3 = init_linear(keys[2], hidden_dims[0], input_dim)
    layers = (fc1, fc2, fc3)

    # Packing happens once, outside the jitted hot path.
    packed, offsets, bias_off = pack_params(layers)
    dims = (latent_dim, hidden_dims[1], hidden_dims[0], input_dim)

    # Latent input z (as would come out of the encoder's reparameterization).
    z = jax.random.normal(keys[3], (batch, latent_dim), jnp.float32)

    out = decoder_forward(z, packed, dims, offsets, bias_off)
    out = jax.block_until_ready(out)

    ref = jax_reference(z, layers)
    assert out.shape == (batch, input_dim)
    assert jnp.allclose(out, ref, atol=1e-5, rtol=1e-5), "mismatch vs JAX ref"

    print("KERNEL_OK")
</pallas_src>

<mosaic_0001>
module attributes {stable_mosaic.version = 11 : i64} {
  func.func @kernel(%arg0: i32, %arg1: memref<8x8xf32, #tpu.memory_space<vmem>>, %arg2: memref<64x128xf32, #tpu.memory_space<vmem>>, %arg3: memref<8x64xf32, #tpu.memory_space<vmem>>) attributes {dimension_semantics = [#tpu.dimension_semantics<parallel>], iteration_bounds = array<i64: 1>, scalar_prefetch = 0 : i64, scratch_operands = 0 : i64, tpu.core_type = #tpu.core_type<tc>, window_params = [{transform_indices = @transform_0, window_bounds = array<i64: 8, 8>}, {pipeline_mode = #tpu.pipeline_mode<synchronous>, transform_indices = @transform_1, window_bounds = array<i64: 64, 128>}, {transform_indices = @transform_2, window_bounds = array<i64: 8, 64>}]} {
    %c0 = arith.constant 0 : index
    %c0_0 = arith.constant 0 : index
    %0 = vector.load %arg2[%c0, %c0_0] : memref<64x128xf32, #tpu.memory_space<vmem>>, vector<8x128xf32>
    %c8 = arith.constant 8 : index
    %c0_1 = arith.constant 0 : index
    %1 = vector.load %arg2[%c8, %c0_1] : memref<64x128xf32, #tpu.memory_space<vmem>>, vector<16x128xf32>
    %c24 = arith.constant 24 : index
    %c0_2 = arith.constant 0 : index
    %2 = vector.load %arg2[%c24, %c0_2] : memref<64x128xf32, #tpu.memory_space<vmem>>, vector<32x128xf32>
    %c56 = arith.constant 56 : index
    %c0_3 = arith.constant 0 : index
    %3 = vector.load %arg2[%c56, %c0_3] : memref<64x128xf32, #tpu.memory_space<vmem>>, vector<1x128xf32>
    %c57 = arith.constant 57 : index
    %c0_4 = arith.constant 0 : index
    %4 = vector.load %arg2[%c57, %c0_4] : memref<64x128xf32, #tpu.memory_space<vmem>>, vector<1x128xf32>
    %c58 = arith.constant 58 : index
    %c0_5 = arith.constant 0 : index
    %5 = vector.load %arg2[%c58, %c0_5] : memref<64x128xf32, #tpu.memory_space<vmem>>, vector<1x128xf32>
    %c0_6 = arith.constant 0 : index
    %c0_7 = arith.constant 0 : index
    %6 = vector.load %arg1[%c0_6, %c0_7] : memref<8x8xf32, #tpu.memory_space<vmem>>, vector<8x8xf32>
    %cst = arith.constant dense<0.000000e+00> : vector<8x128xf32>
    %7 = tpu.matmul %6, %0, %cst {dimension_numbers = #tpu.dot_dimension_numbers<[1], [0], [0], [1], [0, 0, 1, 1], [], []>} : vector<8x8xf32>, vector<8x128xf32>, vector<8x128xf32> -> vector<8x128xf32>
    %8 = vector.broadcast %3 : vector<1x128xf32> to vector<8x128xf32>
    %9 = arith.addf %7, %8 : vector<8x128xf32>
    %cst_8 = arith.constant 0.000000e+00 : f32
    %10 = vector.broadcast %cst_8 : f32 to vector<8x128xf32>
    %11 = arith.maximumf %9, %10 : vector<8x128xf32>
    %12 = vector.extract_strided_slice %11 {offsets = [0, 0], sizes = [8, 16], strides = [1, 1]} : vector<8x128xf32> to vector<8x16xf32>
    %cst_9 = arith.constant dense<0.000000e+00> : vector<8x128xf32>
    %13 = tpu.matmul %12, %1, %cst_9 {dimension_numbers = #tpu.dot_dimension_numbers<[1], [0], [0], [1], [0, 0, 1, 1], [], []>} : vector<8x16xf32>, vector<16x128xf32>, vector<8x128xf32> -> vector<8x128xf32>
    %14 = vector.broadcast %4 : vector<1x128xf32> to vector<8x128xf32>
    %15 = arith.addf %13, %14 : vector<8x128xf32>
    %cst_10 = arith.constant 0.000000e+00 : f32
    %16 = vector.broadcast %cst_10 : f32 to vector<8x128xf32>
    %17 = arith.maximumf %15, %16 : vector<8x128xf32>
    %18 = vector.extract_strided_slice %17 {offsets = [0, 0], sizes = [8, 32], strides = [1, 1]} : vector<8x128xf32> to vector<8x32xf32>
    %cst_11 = arith.constant dense<0.000000e+00> : vector<8x128xf32>
    %19 = tpu.matmul %18, %2, %cst_11 {dimension_numbers = #tpu.dot_dimension_numbers<[1], [0], [0], [1], [0, 0, 1, 1], [], []>} : vector<8x32xf32>, vector<32x128xf32>, vector<8x128xf32> -> vector<8x128xf32>
    %20 = vector.broadcast %5 : vector<1x128xf32> to vector<8x128xf32>
    %21 = arith.addf %19, %20 : vector<8x128xf32>
    %22 = vector.extract_strided_slice %21 {offsets = [0, 0], sizes = [8, 64], strides = [1, 1]} : vector<8x128xf32> to vector<8x64xf32>
    %23 = arith.negf %22 : vector<8x64xf32>
    %24 = math.exp %23 : vector<8x64xf32>
    %cst_12 = arith.constant 1.000000e+00 : f32
    %25 = vector.broadcast %cst_12 : f32 to vector<8x64xf32>
    %26 = arith.addf %25, %24 : vector<8x64xf32>
    %27 = arith.divf %25, %26 : vector<8x64xf32>
    %c0_13 = arith.constant 0 : index
    %c0_14 = arith.constant 0 : index
    %28 = vector.load %arg3[%c0_13, %c0_14] : memref<8x64xf32, #tpu.memory_space<vmem>>, vector<8x64xf32>
    tpu.vector_store %arg3[%c0_13, %c0_14], %27 {strides = array<i32>} : memref<8x64xf32, #tpu.memory_space<vmem>>, vector<8x64xf32>,
    return
  }
  func.func @transform_0(%arg0: i32) -> (i32, i32) {
    %c0_i32 = arith.constant 0 : i32
    %c0_i32_0 = arith.constant 0 : i32
    return %arg0, %c0_i32 : i32, i32
  }
  func.func @transform_1(%arg0: i32) -> (i32, i32) {
    %c0_i32 = arith.constant 0 : i32
    %c0_i32_0 = arith.constant 0 : i32
    %c0_i32_1 = arith.constant 0 : i32
    return %c0_i32, %c0_i32_0 : i32, i32
  }
  func.func @transform_2(%arg0: i32) -> (i32, i32) {
    %c0_i32 = arith.constant 0 : i32
    %c0_i32_0 = arith.constant 0 : i32
    return %arg0, %c0_i32 : i32, i32
  }
}

</mosaic_0001>

<bundles_post_ra>
// kernel: decoder_forward.1
= control target key start
LH: loop header
LB: loop body
LE: loop exit
PB: predicated region body
PF: predicated region fallthrough
CT: control target
= control target key end

     0   :  { %7 = vsyncpa [#allocation3], 0  ;;  %s457_s0 = inlined_call_operand.hbm [shape: f32[8,8], index: 0, kind: input, shape index: {}]   ;;  %s458_s1 = inlined_call_operand.hbm [shape: f32[64,128], index: 1, kind: input, shape index: {}]   ;;  %s459_s2 = inlined_call_operand.hbm [shape: f32[8,64], index: 2, kind: output, shape index: {}]  }
   0x1   :  { %8 = vsyncpa [#allocation6], 0 }
   0x2   :  { %9 = vsyncpa [#allocation4], 0  ;;  %s426_s9 = smov [#allocation2]   ;;  %s427_s11 = smov [#allocation5]  }
   0x3   :  { %s16_s10 = sshll.u32 %s426_s9, 4  ;;  %s25_s12 = sshll.u32 %s427_s11, 4  ;;  %s17_s10 = int_to_ptr.vmem [resolvable:$true] %s16_s10  ;;  %s26_s12 = int_to_ptr.vmem [resolvable:$true] %s25_s12 }
   0x4   :  { %s368_s13 = scalar_lea.vmem %s17_s10, 128  ;;  %p373_p1 = scmp.lt.s32.totalorder %s17_s10, %s17_s10 }
   0x5   :  { %p369_p0 = scmp.ne.s32.totalorder %s17_s10, %s368_s13  ;;  %p374_p2 = scmp.lt.s32.totalorder %s368_s13, %s368_s13 }
   0x7   :  { %p375_p3 = por %p374_p2, %p373_p1 }
   0x9   :  { %p376_p4 = pnand %p375_p3, %p369_p0 }
   0xb   :  { %379 = shalt.err (!%p376_p4)
}
   0xc   :  { %19 = dma.hbm_to_vmem [thread:$0]  %s457_s0, 128, %s17_s10, [#allocation3]  }
   0xd   :  { %s388_s16 = scalar_lea.vmem %s26_s12, 1024  ;;  %p393_p6 = scmp.lt.s32.totalorder %s26_s12, %s26_s12 }
   0xe   :  { %p389_p5 = scmp.ne.s32.totalorder %s26_s12, %s388_s16  ;;  %p394_p7 = scmp.lt.s32.totalorder %s388_s16, %s388_s16 }
  0x10   :  { %p395_p8 = por %p394_p7, %p393_p6 }
  0x12   :  { %p396_p9 = pnand %p395_p8, %p389_p5 }
  0x14   :  { %399 = shalt.err (!%p396_p9)
}
  0x15   :  { %s428_s17 = smov 128   ;;  %s429_s18 = smov 8  }
  0x16   :  { %31 = dma.hbm_to_vmem [thread:$0]  %s458_s1, 1024, %s26_s12, [#allocation6], %s428_s17, %s428_s17, %s429_s18  }
  0x17   :  { %420 = dma.done.wait [#allocation3], 128  }
  0x18   :  { %421 = vsyncadd [#allocation3], 4294967168 }
  0x19   :  { %422 = dma.done.wait [#allocation6], 1024  }
  0x1a   :  { %423 = vsyncadd [#allocation6], 4294966272  ;;  %v430_v0 = vmov 0.0   ;;  %vm431_vm0 = vmmov 0   ;;  %vm53_vm1 = vcmask 64512   ;;  %v38_v1 = vld [vmem:[#allocation5] sm:$0xff] }
  0x1b   :  { %326 = vmatprep.subr.mxu1 %v430_v0  ;;  %328 = vmatprep.mubr.msk.f32.mxu1 %vm431_vm0, %v430_v0  ;;  %v48_v2 = vld [vmem:[#allocation2] sm:$0xff]  ;;  %v40_v3 = vld [vmem:[#allocation5 + $0x10] sm:$0xff]  ;;  %v39_v4 = vld [vmem:[#allocation5 + $0x8] sm:$0xff]  ;;  %vm132_vm2 = vcmask 130048   ;;  %vm211_vm3 = vcmask 261120   ;;  %s432_s0 = smov [#allocation7]  }
  0x1c   :  { %338 = vmatprep.subr.mxu0 %v430_v0  ;;  %346 = vmatprep.mubr.msk.f32.mxu0 %vm431_vm0, %v430_v0  ;;  %v44_v5 = vld [vmem:[#allocation5 + $0x30] sm:$0xff]  ;;  %v309_v6 = vld [vmem:[#allocation5 + $0x38] ss:$0 sm:$0xff]  ;;  %v43_v11 = vld [vmem:[#allocation5 + $0x28] sm:$0xff]  ;;  %s299_s1 = sshll.u32 %s432_s0, 4  ;;  %vm291_vm4 = vcmask 523264   ;;  %s300_s1 = int_to_ptr.vmem [resolvable:$true] %s299_s1 }
  0x1d   :  { %327 = vmatpush3.msra.mxu1 %v38_v1  ;;  %339 = vmatpush3.msra.mxu0 %v44_v5  ;;  %v42_v12 = vld [vmem:[#allocation5 + $0x20] sm:$0xff]  ;;  %v41_v13 = vld [vmem:[#allocation5 + $0x18] sm:$0xff]  ;;  %s400_s21 = scalar_lea.vmem %s300_s1, 128  ;;  %p405_p11 = scmp.lt.s32.totalorder %s300_s1, %s300_s1 }
  0x1e   :  { %329 = vmatmul.mubr.msk.f32.vlgmr.msra.gmra.mxu1 %vm53_vm1, %v48_v2  ;;  %331 = vmatprep.subr.mxu1 %v430_v0  ;;  %v311_v14 = vld [vmem:[#allocation5 + $0x39] ss:$0 sm:$0xff]  ;;  %v313_v19 = vld [vmem:[#allocation5 + $0x3a] ss:$0 sm:$0xff]  ;;  %p401_p10 = scmp.ne.s32.totalorder %s300_s1, %s400_s21  ;;  %p406_p12 = scmp.lt.s32.totalorder %s400_s21, %s400_s21 }
  0x1f   :  { %335 = vmatprep.mubr.msk.f32.mxu1 %vm431_vm0, %v430_v0  ;;  %332 = vmatpush3.msra.mxu1 %v40_v3 }
  0x20   :  { %333 = vmatprep.subr.mxu1 %v430_v0  ;;  %340 = vmatprep.subr.mxu0 %v430_v0  ;;  %p407_p13 = por %p406_p12, %p405_p11 }
  0x21   :  { %334 = vmatpush3.msra.mxu1 %v39_v4  ;;  %341 = vmatpush3.msra.mxu0 %v43_v11 }
  0x22   :  { %342 = vmatprep.subr.mxu0 %v430_v0  ;;  %p408_p0 = pnand %p407_p13, %p401_p10 }
  0x23   :  { %343 = vmatpush3.msra.mxu0 %v42_v12 }
  0x24   :  { %344 = vmatprep.subr.mxu0 %v430_v0 }
  0x25   :  { %345 = vmatpush3.msra.mxu0 %v41_v13 }
  0xde   :  { %v123_v7 = vpop.f32.mrf.mxu1 }
  0xdf   :  { %v124_v8 = vadd.f32 %v309_v6, %v123_v7 }
  0xe0   :  { %v330_v9 = vpop.f32.mrf.mxu1 }
  0xe1   :  { %v127_v10 = vmax.f32 %v124_v8, 0.0 }
  0xe3   :  { %336 = vmatmul.mubr.msk.f32.vlgmr.msra.gmra.mxu1 %vm132_vm2, %v127_v10 }
 0x1a3   :  { %v202_v15 = vpop.f32.mrf.mxu1 }
 0x1a4   :  { %v203_v16 = vadd.f32 %v311_v14, %v202_v15 }
 0x1a5   :  { %v337_v17 = vpop.f32.mrf.mxu1 }
 0x1a6   :  { %v206_v18 = vmax.f32 %v203_v16, 0.0 }
 0x1a8   :  { %347 = vmatmul.mubr.msk.f32.vlgmr.msra.gmra.mxu0 %vm211_vm3, %v206_v18 }
 0x268   :  { %v281_v20 = vpop.f32.mrf.mxu0 }
 0x269   :  { %v282_v21 = vadd.f32 %v313_v19, %v281_v20 }
 0x26a   :  { %v348_v22 = vpop.f32.mrf.mxu0 }
 0x26b   :  { %v315_v23 = vmul.f32 -1.442695, %v282_v21 }
 0x26d   :  { %356 = vpow2.f32 %v315_v23 }
 0x27a   :  { %v357_v24 = vpop.eup %356 }
 0x27b   :  { %v288_v25 = vadd.f32 1.0, %v357_v24 }
 0x27d   :  { %358 = vrcp.f32 %v288_v25 }
 0x28a   :  { %v359_v26 = vpop.eup %358 }
 0x28b   :  { %292 = vst.msk [vmem:[#allocation7] sm:$0xff] %vm291_vm4, %v359_v26 }
 0x28c   :  { %411 = shalt.err (!%p408_p0)
}
 0x28d   :  { %302 = dma.vmem_to_hbm [thread:$0]  %s300_s1, 128, %s459_s2, [#allocation4]  }
 0x28e   :  { %424 = dma.done.wait [#allocation4], 128  }
 0x28f   :  { %425 = vsyncadd [#allocation4], 4294967168 }
 0x290   :  { %306 = vsyncpa [#allocation3], 1 }
 0x291   :  { %307 = vsyncpa [#allocation6], 1 }
 0x292   :  { %308 = vsyncpa [#allocation4], 1 }

</bundles_post_ra>
